<compile_context>
chip_gen: v5e
topology: v5e:2x2
jax: 0.10.0
libtpu: 0.0.40
codegen_flags: <defaults>
</compile_context>

<pallas_src>
import functools
import math

import jax
import jax.numpy as jnp
from jax.experimental import pallas as pl
from jax.experimental.pallas import tpu as pltpu


def _round_up(n, m):
    return ((n + m - 1) // m) * m


def _mlp_kernel(x_ref, vecs_ref, *refs, layer_meta, eps=1e-5, neg_slope=0.01):
    """Fused MLP on one row-tile.

    x_ref    : (tile_n, din)   input rows (leading dims flattened in the wrapper)
    vecs_ref : (3*L, Cmax)     rows [3i]=bias_i, [3i+1]=gamma_i, [3i+2]=beta_i
    refs     : per-layer weight refs (Cin_i, Cout_i), followed by the output ref.
    All intermediates live in vregs/VMEM; only the final result is stored.
    """
    o_ref = refs[-1]
    w_refs = refs[:-1]

    h = x_ref[...]
    for i, (cout, apply_ln_act) in enumerate(layer_meta):
        w = w_refs[i][...]
        # One MXU contraction per layer; operands in the parameter dtype (bf16 if the
        # params are stored in bf16), f32 accumulation.
        y = jnp.dot(h.astype(w.dtype), w, preferred_element_type=jnp.float32)
        y = y + vecs_ref[3 * i: 3 * i + 1, 0:cout]                # bias, (1, cout)
        if apply_ln_act:
            # LayerNorm over the channel (lane) axis, torch defaults
            # (eps=1e-5, biased variance); one-pass statistics.
            inv_c = 1.0 / cout
            mean = jnp.sum(y, axis=-1, keepdims=True) * inv_c
            ex2 = jnp.sum(y * y, axis=-1, keepdims=True) * inv_c
            var = ex2 - mean * mean
            y = (y - mean) * jax.lax.rsqrt(var + eps)
            y = (y * vecs_ref[3 * i + 1: 3 * i + 2, 0:cout]
                 + vecs_ref[3 * i + 2: 3 * i + 3, 0:cout])
            # LeakyReLU(negative_slope=0.01)
            y = jnp.where(y >= 0, y, neg_slope * y)
        h = y

    o_ref[...] = h.astype(o_ref.dtype)


def _choose_row_tile(n, widths, max_rows_per_step):
    """Pick the row tile: as large as possible (amortise per-step overhead), but
    (a) at least 2 grid steps when n is large so both v7x TensorCores are used, and
    (b) within a conservative VMEM budget (v7x: 64 MiB physical / 32 MiB scoped default)."""
    lane_pad = lambda c: _round_up(max(int(c), 1), 128)
    # Conservative estimate: double-buffered in/out blocks + a few live activation slabs (f32).
    per_row_bytes = 4 * (2 * lane_pad(widths[0]) + 2 * lane_pad(widths[-1])
                         + 4 * lane_pad(max(widths)))
    vmem_budget = 24 * 1024 * 1024
    cap = max(8, (vmem_budget // per_row_bytes) // 8 * 8)
    if n <= 1024:
        tile = _round_up(max(n, 1), 8)
    else:
        tile = min(max_rows_per_step, _round_up((n + 1) // 2, 8))   # >=2 steps (v7x megacore)
    return max(8, min(tile, cap))


def predictor_forward(x, weights, vecs, layer_meta, *, max_rows_per_step=4096):
    """x: [..., input_dim] -> [..., output_dim] via a single fused Pallas kernel."""
    *lead, din = x.shape
    xf = x.reshape(-1, din)                      # no dtype cast, no HBM pad copy
    n = xf.shape[0]
    dout = layer_meta[-1][0]

    widths = [din] + [c for c, _ in layer_meta]
    tile_n = _choose_row_tile(n, widths, max_rows_per_step)
    grid = (pl.cdiv(n, tile_n),)                 # ragged last tile -> masked boundary block

    kernel = functools.partial(_mlp_kernel, layer_meta=tuple(layer_meta))

    in_specs = [pl.BlockSpec((tile_n, din), lambda i: (i, 0)),
                pl.BlockSpec(vecs.shape, lambda i: (0, 0))]
    for w in weights:
        in_specs.append(pl.BlockSpec(w.shape, lambda i: (0, 0)))   # grid-invariant weights

    out = pl.pallas_call(
        kernel,
        out_shape=jax.ShapeDtypeStruct((n, dout), x.dtype),
        grid=grid,
        in_specs=in_specs,
        out_specs=pl.BlockSpec((tile_n, dout), lambda i: (i, 0)),
        compiler_params=pltpu.CompilerParams(
            dimension_semantics=("parallel",),
            vmem_limit_bytes=48 * 1024 * 1024),
    )(xf, vecs, *weights)

    return out.reshape(*lead, dout)


def init_predictor_params(key, input_dim, hidden_dim, output_dim, n_layer=3,
                          dtype=jnp.float32):
    """Mirror Predictor.__init__ with init_method='xavier':
    Linear weights xavier_uniform, biases 0, LayerNorm gamma=1 / beta=0.
    Returns (weights, vecs, layer_meta):
      weights    : list of [Cin, Cout] arrays (transpose of torch's [Cout, Cin])
      vecs       : (3*L, Cmax) packed bias / gamma / beta rows
      layer_meta : tuple of (Cout, apply_ln_act) per layer
    """
    dims = [(input_dim, hidden_dim)]
    cur = hidden_dim
    for _ in range(n_layer - 1):
        nxt = max(cur // 2, output_dim)
        dims.append((cur, nxt))
        cur = nxt
    dims.append((cur, output_dim))               # final Linear: no LN / activation

    cmax = max(c for _, c in dims)
    weights, vec_rows, layer_meta = [], [], []
    for i, (cin, cout) in enumerate(dims):
        key, sub = jax.random.split(key)
        bound = math.sqrt(6.0 / (cin + cout))    # xavier_uniform
        weights.append(jax.random.uniform(sub, (cin, cout), dtype, -bound, bound))
        bias = jnp.zeros((cmax,), jnp.float32)
        gamma = jnp.zeros((cmax,), jnp.float32).at[:cout].set(1.0)
        beta = jnp.zeros((cmax,), jnp.float32)
        vec_rows += [bias, gamma, beta]
        layer_meta.append((cout, i < len(dims) - 1))
    vecs = jnp.stack(vec_rows)                   # (3*L, Cmax)
    return weights, vecs, tuple(layer_meta)


def predictor_reference(x, weights, vecs, layer_meta):
    """Pure-JAX reference for validation (matches torch semantics)."""
    *lead, din = x.shape
    h = x.reshape(-1, din).astype(jnp.float32)
    for i, (cout, ln_act) in enumerate(layer_meta):
        w = weights[i].astype(jnp.float32)
        y = jnp.dot(h, w, precision=jax.lax.Precision.HIGHEST) + vecs[3 * i, :cout]
        if ln_act:
            mean = y.mean(-1, keepdims=True)
            var = ((y - mean) ** 2).mean(-1, keepdims=True)
            y = (y - mean) / jnp.sqrt(var + 1e-5)
            y = y * vecs[3 * i + 1, :cout] + vecs[3 * i + 2, :cout]
            y = jnp.where(y >= 0, y, 0.01 * y)
        h = y
    return h.reshape(*lead, h.shape[-1])


if __name__ == "__main__":
    # Shapes consistent with the module: input_dim=4, hidden_dim=32, output_dim=8,
    # n_layer=3  => Linear dims 4 -> 32 -> 16 -> 8 -> 8.
    B, L = 2, 8
    input_dim, hidden_dim, output_dim = 4, 32, 8

    key = jax.random.PRNGKey(0)
    kx, kp = jax.random.split(key)
    x = jax.random.normal(kx, (B, L, input_dim), dtype=jnp.float32)
    weights, vecs, layer_meta = init_predictor_params(
        kp, input_dim, hidden_dim, output_dim, n_layer=3)

    out = predictor_forward(x, weights, vecs, layer_meta)
    out = jax.block_until_ready(out)

    ref = predictor_reference(x, weights, vecs, layer_meta)
    assert out.shape == (B, L, output_dim), out.shape
    err = float(jnp.max(jnp.abs(out.astype(jnp.float32) - ref)))
    # f32 end to end; small slack for MXU-vs-XLA matmul precision differences.
    assert err < 5e-3, f"kernel mismatch vs reference, max abs err = {err}"

    print("KERNEL_OK")
</pallas_src>

<mosaic_0001>
module attributes {stable_mosaic.version = 11 : i64} {
  func.func @_mlp_kernel(%arg0: i32, %arg1: memref<16x4xf32, #tpu.memory_space<vmem>>, %arg2: memref<12x32xf32, #tpu.memory_space<vmem>>, %arg3: memref<4x32xf32, #tpu.memory_space<vmem>>, %arg4: memref<32x16xf32, #tpu.memory_space<vmem>>, %arg5: memref<16x8xf32, #tpu.memory_space<vmem>>, %arg6: memref<8x8xf32, #tpu.memory_space<vmem>>, %arg7: memref<16x8xf32, #tpu.memory_space<vmem>>) attributes {dimension_semantics = [#tpu.dimension_semantics<parallel>], iteration_bounds = array<i64: 1>, scalar_prefetch = 0 : i64, scratch_operands = 0 : i64, tpu.core_type = #tpu.core_type<tc>, window_params = [{transform_indices = @transform_0, window_bounds = array<i64: 16, 4>}, {pipeline_mode = #tpu.pipeline_mode<synchronous>, transform_indices = @transform_1, window_bounds = array<i64: 12, 32>}, {pipeline_mode = #tpu.pipeline_mode<synchronous>, transform_indices = @transform_2, window_bounds = array<i64: 4, 32>}, {pipeline_mode = #tpu.pipeline_mode<synchronous>, transform_indices = @transform_3, window_bounds = array<i64: 32, 16>}, {pipeline_mode = #tpu.pipeline_mode<synchronous>, transform_indices = @transform_4, window_bounds = array<i64: 16, 8>}, {pipeline_mode = #tpu.pipeline_mode<synchronous>, transform_indices = @transform_5, window_bounds = array<i64: 8, 8>}, {transform_indices = @transform_6, window_bounds = array<i64: 16, 8>}]} {
    %c0 = arith.constant 0 : index
    %c0_0 = arith.constant 0 : index
    %0 = vector.load %arg1[%c0, %c0_0] : memref<16x4xf32, #tpu.memory_space<vmem>>, vector<16x4xf32>
    %c0_1 = arith.constant 0 : index
    %c0_2 = arith.constant 0 : index
    %1 = vector.load %arg3[%c0_1, %c0_2] : memref<4x32xf32, #tpu.memory_space<vmem>>, vector<4x32xf32>
    %cst = arith.constant dense<0.000000e+00> : vector<16x32xf32>
    %2 = tpu.matmul %0, %1, %cst {dimension_numbers = #tpu.dot_dimension_numbers<[1], [0], [0], [1], [0, 0, 1, 1], [], []>} : vector<16x4xf32>, vector<4x32xf32>, vector<16x32xf32> -> vector<16x32xf32>
    %c0_3 = arith.constant 0 : index
    %c0_4 = arith.constant 0 : index
    %3 = vector.load %arg2[%c0_3, %c0_4] : memref<12x32xf32, #tpu.memory_space<vmem>>, vector<1x32xf32>
    %4 = vector.broadcast %3 : vector<1x32xf32> to vector<16x32xf32>
    %5 = arith.addf %2, %4 : vector<16x32xf32>
    %cst_5 = arith.constant dense<0.000000e+00> : vector<16xf32>
    %6 = vector.multi_reduction <add>, %5, %cst_5 [1] : vector<16x32xf32> to vector<16xf32>
    %7 = vector.shape_cast %6 : vector<16xf32> to vector<16x1xf32>
    %cst_6 = arith.constant 3.125000e-02 : f32
    %8 = vector.broadcast %cst_6 : f32 to vector<16x1xf32>
    %9 = arith.mulf %7, %8 : vector<16x1xf32>
    %10 = arith.mulf %5, %5 : vector<16x32xf32>
    %cst_7 = arith.constant dense<0.000000e+00> : vector<16xf32>
    %11 = vector.multi_reduction <add>, %10, %cst_7 [1] : vector<16x32xf32> to vector<16xf32>
    %12 = vector.shape_cast %11 : vector<16xf32> to vector<16x1xf32>
    %cst_8 = arith.constant 3.125000e-02 : f32
    %13 = vector.broadcast %cst_8 : f32 to vector<16x1xf32>
    %14 = arith.mulf %12, %13 : vector<16x1xf32>
    %15 = arith.mulf %9, %9 : vector<16x1xf32>
    %16 = arith.subf %14, %15 : vector<16x1xf32>
    %17 = vector.broadcast %9 : vector<16x1xf32> to vector<16x32xf32>
    %18 = arith.subf %5, %17 : vector<16x32xf32>
    %cst_9 = arith.constant 9.99999974E-6 : f32
    %19 = vector.broadcast %cst_9 : f32 to vector<16x1xf32>
    %20 = arith.addf %16, %19 : vector<16x1xf32>
    %21 = math.rsqrt %20 : vector<16x1xf32>
    %22 = vector.broadcast %21 : vector<16x1xf32> to vector<16x32xf32>
    %23 = arith.mulf %18, %22 : vector<16x32xf32>
    %c1 = arith.constant 1 : index
    %c0_10 = arith.constant 0 : index
    %24 = vector.load %arg2[%c1, %c0_10] : memref<12x32xf32, #tpu.memory_space<vmem>>, vector<1x32xf32>
    %25 = vector.broadcast %24 : vector<1x32xf32> to vector<16x32xf32>
    %26 = arith.mulf %23, %25 : vector<16x32xf32>
    %c2 = arith.constant 2 : index
    %c0_11 = arith.constant 0 : index
    %27 = vector.load %arg2[%c2, %c0_11] : memref<12x32xf32, #tpu.memory_space<vmem>>, vector<1x32xf32>
    %28 = vector.broadcast %27 : vector<1x32xf32> to vector<16x32xf32>
    %29 = arith.addf %26, %28 : vector<16x32xf32>
    %cst_12 = arith.constant 0.000000e+00 : f32
    %30 = vector.broadcast %cst_12 : f32 to vector<16x32xf32>
    %31 = arith.cmpf oge, %29, %30 : vector<16x32xf32>
    %cst_13 = arith.constant 0.00999999977 : f32
    %32 = vector.broadcast %cst_13 : f32 to vector<16x32xf32>
    %33 = arith.mulf %32, %29 : vector<16x32xf32>
    %34 = arith.select %31, %29, %33 : vector<16x32xi1>, vector<16x32xf32>
    %c0_14 = arith.constant 0 : index
    %c0_15 = arith.constant 0 : index
    %35 = vector.load %arg4[%c0_14, %c0_15] : memref<32x16xf32, #tpu.memory_space<vmem>>, vector<32x16xf32>
    %cst_16 = arith.constant dense<0.000000e+00> : vector<16x16xf32>
    %36 = tpu.matmul %34, %35, %cst_16 {dimension_numbers = #tpu.dot_dimension_numbers<[1], [0], [0], [1], [0, 0, 1, 1], [], []>} : vector<16x32xf32>, vector<32x16xf32>, vector<16x16xf32> -> vector<16x16xf32>
    %c3 = arith.constant 3 : index
    %c0_17 = arith.constant 0 : index
    %37 = vector.load %arg2[%c3, %c0_17] : memref<12x32xf32, #tpu.memory_space<vmem>>, vector<1x16xf32>
    %38 = vector.broadcast %37 : vector<1x16xf32> to vector<16x16xf32>
    %39 = arith.addf %36, %38 : vector<16x16xf32>
    %cst_18 = arith.constant dense<0.000000e+00> : vector<16xf32>
    %40 = vector.multi_reduction <add>, %39, %cst_18 [1] : vector<16x16xf32> to vector<16xf32>
    %41 = vector.shape_cast %40 : vector<16xf32> to vector<16x1xf32>
    %cst_19 = arith.constant 6.250000e-02 : f32
    %42 = vector.broadcast %cst_19 : f32 to vector<16x1xf32>
    %43 = arith.mulf %41, %42 : vector<16x1xf32>
    %44 = arith.mulf %39, %39 : vector<16x16xf32>
    %cst_20 = arith.constant dense<0.000000e+00> : vector<16xf32>
    %45 = vector.multi_reduction <add>, %44, %cst_20 [1] : vector<16x16xf32> to vector<16xf32>
    %46 = vector.shape_cast %45 : vector<16xf32> to vector<16x1xf32>
    %cst_21 = arith.constant 6.250000e-02 : f32
    %47 = vector.broadcast %cst_21 : f32 to vector<16x1xf32>
    %48 = arith.mulf %46, %47 : vector<16x1xf32>
    %49 = arith.mulf %43, %43 : vector<16x1xf32>
    %50 = arith.subf %48, %49 : vector<16x1xf32>
    %51 = vector.broadcast %43 : vector<16x1xf32> to vector<16x16xf32>
    %52 = arith.subf %39, %51 : vector<16x16xf32>
    %cst_22 = arith.constant 9.99999974E-6 : f32
    %53 = vector.broadcast %cst_22 : f32 to vector<16x1xf32>
    %54 = arith.addf %50, %53 : vector<16x1xf32>
    %55 = math.rsqrt %54 : vector<16x1xf32>
    %56 = vector.broadcast %55 : vector<16x1xf32> to vector<16x16xf32>
    %57 = arith.mulf %52, %56 : vector<16x16xf32>
    %c4 = arith.constant 4 : index
    %c0_23 = arith.constant 0 : index
    %58 = vector.load %arg2[%c4, %c0_23] : memref<12x32xf32, #tpu.memory_space<vmem>>, vector<1x16xf32>
    %59 = vector.broadcast %58 : vector<1x16xf32> to vector<16x16xf32>
    %60 = arith.mulf %57, %59 : vector<16x16xf32>
    %c5 = arith.constant 5 : index
    %c0_24 = arith.constant 0 : index
    %61 = vector.load %arg2[%c5, %c0_24] : memref<12x32xf32, #tpu.memory_space<vmem>>, vector<1x16xf32>
    %62 = vector.broadcast %61 : vector<1x16xf32> to vector<16x16xf32>
    %63 = arith.addf %60, %62 : vector<16x16xf32>
    %cst_25 = arith.constant 0.000000e+00 : f32
    %64 = vector.broadcast %cst_25 : f32 to vector<16x16xf32>
    %65 = arith.cmpf oge, %63, %64 : vector<16x16xf32>
    %cst_26 = arith.constant 0.00999999977 : f32
    %66 = vector.broadcast %cst_26 : f32 to vector<16x16xf32>
    %67 = arith.mulf %66, %63 : vector<16x16xf32>
    %68 = arith.select %65, %63, %67 : vector<16x16xi1>, vector<16x16xf32>
    %c0_27 = arith.constant 0 : index
    %c0_28 = arith.constant 0 : index
    %69 = vector.load %arg5[%c0_27, %c0_28] : memref<16x8xf32, #tpu.memory_space<vmem>>, vector<16x8xf32>
    %cst_29 = arith.constant dense<0.000000e+00> : vector<16x8xf32>
    %70 = tpu.matmul %68, %69, %cst_29 {dimension_numbers = #tpu.dot_dimension_numbers<[1], [0], [0], [1], [0, 0, 1, 1], [], []>} : vector<16x16xf32>, vector<16x8xf32>, vector<16x8xf32> -> vector<16x8xf32>
    %c6 = arith.constant 6 : index
    %c0_30 = arith.constant 0 : index
    %71 = vector.load %arg2[%c6, %c0_30] : memref<12x32xf32, #tpu.memory_space<vmem>>, vector<1x8xf32>
    %72 = vector.broadcast %71 : vector<1x8xf32> to vector<16x8xf32>
    %73 = arith.addf %70, %72 : vector<16x8xf32>
    %cst_31 = arith.constant dense<0.000000e+00> : vector<16xf32>
    %74 = vector.multi_reduction <add>, %73, %cst_31 [1] : vector<16x8xf32> to vector<16xf32>
    %75 = vector.shape_cast %74 : vector<16xf32> to vector<16x1xf32>
    %cst_32 = arith.constant 1.250000e-01 : f32
    %76 = vector.broadcast %cst_32 : f32 to vector<16x1xf32>
    %77 = arith.mulf %75, %76 : vector<16x1xf32>
    %78 = arith.mulf %73, %73 : vector<16x8xf32>
    %cst_33 = arith.constant dense<0.000000e+00> : vector<16xf32>
    %79 = vector.multi_reduction <add>, %78, %cst_33 [1] : vector<16x8xf32> to vector<16xf32>
    %80 = vector.shape_cast %79 : vector<16xf32> to vector<16x1xf32>
    %cst_34 = arith.constant 1.250000e-01 : f32
    %81 = vector.broadcast %cst_34 : f32 to vector<16x1xf32>
    %82 = arith.mulf %80, %81 : vector<16x1xf32>
    %83 = arith.mulf %77, %77 : vector<16x1xf32>
    %84 = arith.subf %82, %83 : vector<16x1xf32>
    %85 = vector.broadcast %77 : vector<16x1xf32> to vector<16x8xf32>
    %86 = arith.subf %73, %85 : vector<16x8xf32>
    %cst_35 = arith.constant 9.99999974E-6 : f32
    %87 = vector.broadcast %cst_35 : f32 to vector<16x1xf32>
    %88 = arith.addf %84, %87 : vector<16x1xf32>
    %89 = math.rsqrt %88 : vector<16x1xf32>
    %90 = vector.broadcast %89 : vector<16x1xf32> to vector<16x8xf32>
    %91 = arith.mulf %86, %90 : vector<16x8xf32>
    %c7 = arith.constant 7 : index
    %c0_36 = arith.constant 0 : index
    %92 = vector.load %arg2[%c7, %c0_36] : memref<12x32xf32, #tpu.memory_space<vmem>>, vector<1x8xf32>
    %93 = vector.broadcast %92 : vector<1x8xf32> to vector<16x8xf32>
    %94 = arith.mulf %91, %93 : vector<16x8xf32>
    %c8 = arith.constant 8 : index
    %c0_37 = arith.constant 0 : index
    %95 = vector.load %arg2[%c8, %c0_37] : memref<12x32xf32, #tpu.memory_space<vmem>>, vector<1x8xf32>
    %96 = vector.broadcast %95 : vector<1x8xf32> to vector<16x8xf32>
    %97 = arith.addf %94, %96 : vector<16x8xf32>
    %cst_38 = arith.constant 0.000000e+00 : f32
    %98 = vector.broadcast %cst_38 : f32 to vector<16x8xf32>
    %99 = arith.cmpf oge, %97, %98 : vector<16x8xf32>
    %cst_39 = arith.constant 0.00999999977 : f32
    %100 = vector.broadcast %cst_39 : f32 to vector<16x8xf32>
    %101 = arith.mulf %100, %97 : vector<16x8xf32>
    %102 = arith.select %99, %97, %101 : vector<16x8xi1>, vector<16x8xf32>
    %c0_40 = arith.constant 0 : index
    %c0_41 = arith.constant 0 : index
    %103 = vector.load %arg6[%c0_40, %c0_41] : memref<8x8xf32, #tpu.memory_space<vmem>>, vector<8x8xf32>
    %cst_42 = arith.constant dense<0.000000e+00> : vector<16x8xf32>
    %104 = tpu.matmul %102, %103, %cst_42 {dimension_numbers = #tpu.dot_dimension_numbers<[1], [0], [0], [1], [0, 0, 1, 1], [], []>} : vector<16x8xf32>, vector<8x8xf32>, vector<16x8xf32> -> vector<16x8xf32>
    %c9 = arith.constant 9 : index
    %c0_43 = arith.constant 0 : index
    %105 = vector.load %arg2[%c9, %c0_43] : memref<12x32xf32, #tpu.memory_space<vmem>>, vector<1x8xf32>
    %106 = vector.broadcast %105 : vector<1x8xf32> to vector<16x8xf32>
    %107 = arith.addf %104, %106 : vector<16x8xf32>
    %c0_44 = arith.constant 0 : index
    %c0_45 = arith.constant 0 : index
    %108 = vector.load %arg7[%c0_44, %c0_45] : memref<16x8xf32, #tpu.memory_space<vmem>>, vector<16x8xf32>
    tpu.vector_store %arg7[%c0_44, %c0_45], %107 {strides = array<i32>} : memref<16x8xf32, #tpu.memory_space<vmem>>, vector<16x8xf32>,
    return
  }
  func.func @transform_0(%arg0: i32) -> (i32, i32) {
    %c0_i32 = arith.constant 0 : i32
    %c0_i32_0 = arith.constant 0 : i32
    return %arg0, %c0_i32 : i32, i32
  }
  func.func @transform_1(%arg0: i32) -> (i32, i32) {
    %c0_i32 = arith.constant 0 : i32
    %c0_i32_0 = arith.constant 0 : i32
    %c0_i32_1 = arith.constant 0 : i32
    return %c0_i32, %c0_i32_0 : i32, i32
  }
  func.func @transform_2(%arg0: i32) -> (i32, i32) {
    %c0_i32 = arith.constant 0 : i32
    %c0_i32_0 = arith.constant 0 : i32
    %c0_i32_1 = arith.constant 0 : i32
    return %c0_i32, %c0_i32_0 : i32, i32
  }
  func.func @transform_3(%arg0: i32) -> (i32, i32) {
    %c0_i32 = arith.constant 0 : i32
    %c0_i32_0 = arith.constant 0 : i32
    %c0_i32_1 = arith.constant 0 : i32
    return %c0_i32, %c0_i32_0 : i32, i32
  }
  func.func @transform_4(%arg0: i32) -> (i32, i32) {
    %c0_i32 = arith.constant 0 : i32
    %c0_i32_0 = arith.constant 0 : i32
    %c0_i32_1 = arith.constant 0 : i32
    return %c0_i32, %c0_i32_0 : i32, i32
  }
  func.func @transform_5(%arg0: i32) -> (i32, i32) {
    %c0_i32 = arith.constant 0 : i32
    %c0_i32_0 = arith.constant 0 : i32
    %c0_i32_1 = arith.constant 0 : i32
    return %c0_i32, %c0_i32_0 : i32, i32
  }
  func.func @transform_6(%arg0: i32) -> (i32, i32) {
    %c0_i32 = arith.constant 0 : i32
    %c0_i32_0 = arith.constant 0 : i32
    return %arg0, %c0_i32 : i32, i32
  }
}

</mosaic_0001>

<bundles_post_ra>
// kernel: tpu_custom_call.1
= control target key start
LH: loop header
LB: loop body
LE: loop exit
PB: predicated region body
PF: predicated region fallthrough
CT: control target
= control target key end

     0   :  { %vm35_vm0 = vcmask 1043456   ;;  %vm28_vm1 = vcmask 31744   ;;  %vm62_vm2 = vcmask 261120   ;;  %vm160_vm11 = vcmask 130048   ;;  %s515_s2 = inlined_call_operand.vmem [shape: f32[4,32], index: 2, kind: input, shape index: {}]   ;;  %s516_s0 = inlined_call_operand.vmem [shape: f32[16,4], index: 0, kind: input, shape index: {}]   ;;  %s517_s1 = inlined_call_operand.vmem [shape: f32[12,32], index: 1, kind: input, shape index: {}]   ;;  %s518_s3 = inlined_call_operand.vmem [shape: f32[32,16], index: 3, kind: input, shape index: {}]   ;;  %s519_s4 = inlined_call_operand.vmem [shape: f32[16,8], index: 4, kind: input, shape index: {}]   ;;  %s520_s5 = inlined_call_operand.vmem [shape: f32[8,8], index: 5, kind: input, shape index: {}]   ;;  %s521_s6 = inlined_call_operand.vmem [shape: f32[16,8], index: 6, kind: output, shape index: {}]  }
   0x1   :  { %v25_v0 = vld [vmem:[%s515_s2] sm:$0xf]  ;;  %v24_v2 = vld [vmem:[%s516_s0 + $0x8] sm:$0xff]  ;;  %v128_v15 = vld [vmem:[%s518_s3 + $0x18] sm:$0xff] }
   0x2   :  { %v23_v1 = vld [vmem:[%s516_s0] sm:$0xff]  ;;  %357 = vmatpush.msk.msra.mxu0 %vm35_vm0, %v25_v0  ;;  %149 = vmatpush.msra.mxu1 %v128_v15  ;;  %v127_v16 = vld [vmem:[%s518_s3 + $0x10] sm:$0xff]  ;;  %v126_v18 = vld [vmem:[%s518_s3 + $0x8] sm:$0xff] }
   0x3   :  { %358 = vmatmul.msk.f32.vlgmr.msra.gmra.mxu0 %vm28_vm1, %v23_v1  ;;  %v366_v3 = vld [vmem:[%s517_s1] ss:$0 sm:$0xff]  ;;  %v367_v41 = vld [vmem:[%s517_s1 + $0x1] ss:$0 sm:$0xff]  ;;  %v368_v45 = vld [vmem:[%s517_s1 + $0x2] ss:$0 sm:$0xff] }
   0x4   :  { %150 = vmatpush.msra.mxu1 %v127_v16  ;;  %v125_v21 = vld [vmem:[%s518_s3] sm:$0xff] }
   0x5   :  { %v369_v60 = vld [vmem:[%s517_s1 + $0x3] ss:$0 sm:$0xff] }
   0x6   :  { %151 = vmatpush.msra.mxu1 %v126_v18 }
   0x8   :  { %152 = vmatpush.msra.mxu1 %v125_v21 }
   0xb   :  { %359 = vmatmul.msk.f32.gmra.mxu0 %vm28_vm1, %v24_v2 }
  0x80   :  { %v56_v4 = vpop.f32.mrf.mxu0 }
  0x81   :  { %v57_v5 = vadd.f32 %v366_v3, %v56_v4 }
  0x83   :  { %v63_v6 = vsel %vm62_vm2, %v57_v5, 0.0  ;;  %v71_v7 = vmul.f32 %v57_v5, %v57_v5 }
  0x84   :  { %64 = vadd.xlane.f32.xlu0 %v63_v6 }
  0x85   :  { %v73_v11 = vsel %vm62_vm2, %v71_v7, 0.0 }
  0x88   :  { %v59_v8 = vpop.f32.mrf.mxu0 }
  0x89   :  { %v436_v9 = vadd.f32 %v366_v3, %v59_v8  ;;  %v224_v8 = vld [vmem:[%s519_s4 + $0x8] sm:$0xff] }
  0x8a   :  { %247 = vmatpush.msra.mxu2 %v224_v8 }
  0x8b   :  { %v66_v10 = vsel %vm62_vm2, %v436_v9, 0.0  ;;  %v72_v12 = vmul.f32 %v436_v9, %v436_v9 }
  0x8c   :  { %67 = vadd.xlane.f32.xlu1 %v66_v10  ;;  %74 = vadd.xlane.f32.xlu0 %v73_v11 }
  0x8d   :  { %v76_v13 = vsel %vm62_vm2, %v72_v12, 0.0 }
  0x94   :  { %77 = vadd.xlane.f32.xlu1 %v76_v13 }
  0xf7   :  { %v65_v14 = vpop.xlane.xlu0 %64 }
  0xf8   :  { %v69_v17 = vmul.f32 0.03125, %v65_v14 }
  0xfa   :  { %v81_v22 = vmul.f32 %v69_v17, %v69_v17  ;;  %v85_v40 = vsub.f32 %v57_v5, %v69_v17 }
  0xff   :  { %v68_v19 = vpop.xlane.xlu1 %67  ;;  %v75_v20 = vpop.xlane.xlu0 %74 }
 0x100   :  { %v79_v23 = vmul.f32 0.03125, %v75_v20  ;;  %v70_v25 = vmul.f32 0.03125, %v68_v19 }
 0x102   :  { %v83_v24 = vsub.f32 %v79_v23, %v81_v22  ;;  %v82_v27 = vmul.f32 %v70_v25, %v70_v25  ;;  %v86_v51 = vsub.f32 %v436_v9, %v70_v25  ;;  %v223_v9 = vld [vmem:[%s519_s4] sm:$0xff] }
 0x103   :  { %248 = vmatpush.msra.mxu2 %v223_v9 }
 0x104   :  { %v87_v26 = vadd.f32 1e-05, %v83_v24 }
 0x106   :  { %376 = vrsqrt.f32 %v87_v26  ;;  %vm95_vm4 = vweird.f32 %v87_v26 }
 0x107   :  { %v78_v28 = vpop.xlane.xlu1 %77 }
 0x108   :  { %v80_v29 = vmul.f32 0.03125, %v78_v28 }
 0x10a   :  { %v84_v30 = vsub.f32 %v80_v29, %v82_v27 }
 0x10c   :  { %v377_v31 = vpop.eup %376  ;;  %v88_v32 = vadd.f32 1e-05, %v84_v30 }
 0x10d   :  { %v90_v33 = vmul.f32 %v377_v31, %v87_v26  ;;  %vm96_vm3 = vweird.f32 %v377_v31 }
 0x10e   :  { %378 = vrsqrt.f32 %v88_v32  ;;  %vm97_vm5 = vmor %vm95_vm4, %vm96_vm3  ;;  %vm105_vm7 = vweird.f32 %v88_v32  ;;  %vm256_vm4 = vcmask 64512  }
 0x10f   :  { %v91_v34 = vmul.f32 %v377_v31, %v90_v33 }
 0x111   :  { %v92_v35 = vmul.f32 0.5, %v91_v34 }
 0x113   :  { %v93_v36 = vsub.f32 1.5, %v92_v35  ;;  %v370_v35 = vld [vmem:[%s517_s1 + $0x4] ss:$0 sm:$0xff] }
 0x114   :  { %v379_v37 = vpop.eup %378 }
 0x115   :  { %v94_v38 = vmul.f32 %v377_v31, %v93_v36  ;;  %v100_v39 = vmul.f32 %v379_v37, %v88_v32  ;;  %vm106_vm6 = vweird.f32 %v379_v37 }
 0x116   :  { %vm107_vm8 = vmor %vm105_vm7, %vm106_vm6 }
 0x117   :  { %v98_v42 = vsel %vm97_vm5, %v377_v31, %v94_v38  ;;  %v101_v43 = vmul.f32 %v379_v37, %v100_v39 }
 0x118   :  { %v109_v44 = vmul.f32 %v98_v42, %v85_v40  ;;  %v371_v40 = vld [vmem:[%s517_s1 + $0x5] ss:$0 sm:$0xff] }
 0x119   :  { %v102_v46 = vmul.f32 0.5, %v101_v43 }
 0x11a   :  { %v113_v47 = vmul.f32 %v367_v41, %v109_v44 }
 0x11b   :  { %v103_v48 = vsub.f32 1.5, %v102_v46 }
 0x11c   :  { %v117_v49 = vadd.f32 %v368_v45, %v113_v47 }
 0x11d   :  { %v104_v50 = vmul.f32 %v379_v37, %v103_v48 }
 0x11e   :  { %vm119_vm9 = vcmp.ge.f32.partialorder %v117_v49, 0.0  ;;  %v121_v52 = vmul.f32 0.01, %v117_v49 }
 0x11f   :  { %v108_v53 = vsel %vm107_vm8, %v379_v37, %v104_v50 }
 0x120   :  { %v123_v54 = vsel %vm119_vm9, %v117_v49, %v121_v52  ;;  %v110_v55 = vmul.f32 %v108_v53, %v86_v51  ;;  %v372_v51 = vld [vmem:[%s517_s1 + $0x6] ss:$0 sm:$0xff] }
 0x121   :  { %360 = vmatmul.msk.f32.vlgmr.msra.gmra.mxu1 %vm62_vm2, %v123_v54 }
 0x122   :  { %v114_v56 = vmul.f32 %v367_v41, %v110_v55 }
 0x124   :  { %v118_v57 = vadd.f32 %v368_v45, %v114_v56 }
 0x126   :  { %vm120_vm10 = vcmp.ge.f32.partialorder %v118_v57, 0.0  ;;  %v122_v58 = vmul.f32 0.01, %v118_v57 }
 0x128   :  { %v124_v59 = vsel %vm120_vm10, %v118_v57, %v122_v58 }
 0x129   :  { %361 = vmatmul.msk.f32.gmra.mxu1 %vm62_vm2, %v124_v59 }
 0x19e   :  { %v154_v61 = vpop.f32.mrf.mxu1 }
 0x19f   :  { %v155_v62 = vadd.f32 %v369_v60, %v154_v61 }
 0x1a1   :  { %v161_v63 = vsel %vm160_vm11, %v155_v62, 0.0  ;;  %v169_v0 = vmul.f32 %v155_v62, %v155_v62 }
 0x1a2   :  { %162 = vadd.xlane.f32.xlu2 %v161_v63 }
 0x1a3   :  { %v171_v4 = vsel %vm160_vm11, %v169_v0, 0.0 }
 0x1a6   :  { %v157_v1 = vpop.f32.mrf.mxu1 }
 0x1a7   :  { %v158_v2 = vadd.f32 %v369_v60, %v157_v1  ;;  %v319_v1 = vld [vmem:[%s520_s5] sm:$0xff] }
 0x1a8   :  { %343 = vmatpush.msra.mxu3 %v319_v1 }
 0x1a9   :  { %v164_v3 = vsel %vm160_vm11, %v158_v2, 0.0  ;;  %v170_v5 = vmul.f32 %v158_v2, %v158_v2 }
 0x1aa   :  { %165 = vadd.xlane.f32.xlu0 %v164_v3  ;;  %172 = vadd.xlane.f32.xlu2 %v171_v4 }
 0x1ab   :  { %v174_v6 = vsel %vm160_vm11, %v170_v5, 0.0 }
 0x1ac   :  { %175 = vadd.xlane.f32.xlu1 %v174_v6 }
 0x215   :  { %v163_v7 = vpop.xlane.xlu2 %162 }
 0x216   :  { %v167_v10 = vmul.f32 0.0625, %v163_v7 }
 0x218   :  { %v179_v13 = vmul.f32 %v167_v10, %v167_v10  ;;  %v183_v34 = vsub.f32 %v155_v62, %v167_v10 }
 0x21d   :  { %v166_v11 = vpop.xlane.xlu0 %165  ;;  %v173_v12 = vpop.xlane.xlu2 %172 }
 0x21e   :  { %v168_v14 = vmul.f32 0.0625, %v166_v11  ;;  %v177_v15 = vmul.f32 0.0625, %v173_v12 }
 0x21f   :  { %v176_v16 = vpop.xlane.xlu1 %175 }
 0x220   :  { %v180_v17 = vmul.f32 %v168_v14, %v168_v14  ;;  %v181_v18 = vsub.f32 %v177_v15, %v179_v13  ;;  %v178_v19 = vmul.f32 0.0625, %v176_v16  ;;  %v184_v38 = vsub.f32 %v158_v2, %v168_v14 }
 0x222   :  { %v185_v20 = vadd.f32 1e-05, %v181_v18  ;;  %v182_v21 = vsub.f32 %v178_v19, %v180_v17 }
 0x224   :  { %380 = vrsqrt.f32 %v185_v20  ;;  %v186_v22 = vadd.f32 1e-05, %v182_v21  ;;  %vm193_vm13 = vweird.f32 %v185_v20 }
 0x226   :  { %382 = vrsqrt.f32 %v186_v22  ;;  %vm203_vm0 = vweird.f32 %v186_v22 }
 0x22a   :  { %v381_v23 = vpop.eup %380 }
 0x22b   :  { %v188_v24 = vmul.f32 %v381_v23, %v185_v20  ;;  %vm194_vm12 = vweird.f32 %v381_v23 }
 0x22c   :  { %v383_v25 = vpop.eup %382  ;;  %vm195_vm15 = vmor %vm193_vm13, %vm194_vm12 }
 0x22d   :  { %v189_v26 = vmul.f32 %v381_v23, %v188_v24  ;;  %v198_v27 = vmul.f32 %v383_v25, %v186_v22  ;;  %vm204_vm14 = vweird.f32 %v383_v25  ;;  %v373_v22 = vld [vmem:[%s517_s1 + $0x7] ss:$0 sm:$0xff] }
 0x22e   :  { %vm205_vm1 = vmor %vm203_vm0, %vm204_vm14 }
 0x22f   :  { %v190_v28 = vmul.f32 0.5, %v189_v26  ;;  %v199_v29 = vmul.f32 %v383_v25, %v198_v27  ;;  %v374_v26 = vld [vmem:[%s517_s1 + $0x8] ss:$0 sm:$0xff] }
 0x231   :  { %v191_v30 = vsub.f32 1.5, %v190_v28  ;;  %v200_v31 = vmul.f32 0.5, %v199_v29 }
 0x233   :  { %v192_v32 = vmul.f32 %v381_v23, %v191_v30  ;;  %v201_v33 = vsub.f32 1.5, %v200_v31 }
 0x235   :  { %v196_v36 = vsel %vm195_vm15, %v381_v23, %v192_v32  ;;  %v202_v37 = vmul.f32 %v383_v25, %v201_v33 }
 0x236   :  { %v207_v39 = vmul.f32 %v196_v36, %v183_v34 }
 0x237   :  { %v206_v41 = vsel %vm205_vm1, %v383_v25, %v202_v37 }
 0x238   :  { %v211_v42 = vmul.f32 %v370_v35, %v207_v39  ;;  %v208_v43 = vmul.f32 %v206_v41, %v184_v38  ;;  %v375_v41 = vld [vmem:[%s517_s1 + $0x9] ss:$0 sm:$0xff] }
 0x23a   :  { %v215_v44 = vadd.f32 %v371_v40, %v211_v42  ;;  %v212_v45 = vmul.f32 %v370_v35, %v208_v43 }
 0x23c   :  { %vm217_vm2 = vcmp.ge.f32.partialorder %v215_v44, 0.0  ;;  %v219_v46 = vmul.f32 0.01, %v215_v44  ;;  %v216_v48 = vadd.f32 %v371_v40, %v212_v45 }
 0x23e   :  { %v221_v47 = vsel %vm217_vm2, %v215_v44, %v219_v46  ;;  %v220_v49 = vmul.f32 0.01, %v216_v48  ;;  %vm218_vm3 = vcmp.ge.f32.partialorder %v216_v48, 0.0 }
 0x23f   :  { %362 = vmatmul.msk.f32.vlgmr.msra.gmra.mxu2 %vm160_vm11, %v221_v47 }
 0x240   :  { %v222_v50 = vsel %vm218_vm3, %v216_v48, %v220_v49 }
 0x247   :  { %363 = vmatmul.msk.f32.gmra.mxu2 %vm160_vm11, %v222_v50 }
 0x2c2   :  { %v250_v52 = vpop.f32.mrf.mxu2 }
 0x2c3   :  { %v251_v53 = vadd.f32 %v372_v51, %v250_v52 }
 0x2c5   :  { %v257_v54 = vsel %vm256_vm4, %v251_v53, 0.0  ;;  %v265_v55 = vmul.f32 %v251_v53, %v251_v53 }
 0x2c6   :  { %258 = vadd.xlane.f32.xlu2 %v257_v54 }
 0x2c7   :  { %v267_v56 = vsel %vm256_vm4, %v265_v55, 0.0 }
 0x2c8   :  { %268 = vadd.xlane.f32.xlu0 %v267_v56 }
 0x2ca   :  { %v253_v57 = vpop.f32.mrf.mxu2 }
 0x2cb   :  { %v254_v58 = vadd.f32 %v372_v51, %v253_v57 }
 0x2cd   :  { %v260_v59 = vsel %vm256_vm4, %v254_v58, 0.0  ;;  %v266_v60 = vmul.f32 %v254_v58, %v254_v58 }
 0x2ce   :  { %261 = vadd.xlane.f32.xlu1 %v260_v59 }
 0x2cf   :  { %v270_v61 = vsel %vm256_vm4, %v266_v60, 0.0 }
 0x2d0   :  { %271 = vadd.xlane.f32.xlu2 %v270_v61 }
 0x339   :  { %v259_v62 = vpop.xlane.xlu2 %258 }
 0x33a   :  { %v263_v63 = vmul.f32 0.125, %v259_v62 }
 0x33b   :  { %v269_v0 = vpop.xlane.xlu0 %268 }
 0x33c   :  { %v275_v2 = vmul.f32 %v263_v63, %v263_v63  ;;  %v273_v3 = vmul.f32 0.125, %v269_v0  ;;  %v279_v21 = vsub.f32 %v251_v53, %v263_v63 }
 0x33e   :  { %v277_v4 = vsub.f32 %v273_v3, %v275_v2 }
 0x340   :  { %v281_v5 = vadd.f32 1e-05, %v277_v4 }
 0x341   :  { %v262_v6 = vpop.xlane.xlu1 %261 }
 0x342   :  { %384 = vrsqrt.f32 %v281_v5  ;;  %v264_v7 = vmul.f32 0.125, %v262_v6  ;;  %vm289_vm6 = vweird.f32 %v281_v5 }
 0x343   :  { %v272_v8 = vpop.xlane.xlu2 %271 }
 0x344   :  { %v276_v9 = vmul.f32 %v264_v7, %v264_v7  ;;  %v274_v10 = vmul.f32 0.125, %v272_v8  ;;  %v280_v32 = vsub.f32 %v254_v58, %v264_v7 }
 0x346   :  { %v278_v11 = vsub.f32 %v274_v10, %v276_v9 }
 0x348   :  { %v385_v12 = vpop.eup %384  ;;  %v282_v13 = vadd.f32 1e-05, %v278_v11 }
 0x349   :  { %v284_v14 = vmul.f32 %v385_v12, %v281_v5  ;;  %vm290_vm5 = vweird.f32 %v385_v12 }
 0x34a   :  { %386 = vrsqrt.f32 %v282_v13  ;;  %vm291_vm7 = vmor %vm289_vm6, %vm290_vm5  ;;  %vm299_vm9 = vweird.f32 %v282_v13 }
 0x34b   :  { %v285_v15 = vmul.f32 %v385_v12, %v284_v14 }
 0x34d   :  { %v286_v16 = vmul.f32 0.5, %v285_v15 }
 0x34f   :  { %v287_v17 = vsub.f32 1.5, %v286_v16 }
 0x350   :  { %v387_v18 = vpop.eup %386 }
 0x351   :  { %v288_v19 = vmul.f32 %v385_v12, %v287_v17  ;;  %v294_v20 = vmul.f32 %v387_v18, %v282_v13  ;;  %vm300_vm8 = vweird.f32 %v387_v18 }
 0x352   :  { %vm301_vm10 = vmor %vm299_vm9, %vm300_vm8 }
 0x353   :  { %v292_v23 = vsel %vm291_vm7, %v385_v12, %v288_v19  ;;  %v295_v24 = vmul.f32 %v387_v18, %v294_v20 }
 0x354   :  { %v303_v25 = vmul.f32 %v292_v23, %v279_v21 }
 0x355   :  { %v296_v27 = vmul.f32 0.5, %v295_v24 }
 0x356   :  { %v307_v28 = vmul.f32 %v373_v22, %v303_v25 }
 0x357   :  { %v297_v29 = vsub.f32 1.5, %v296_v27 }
 0x358   :  { %v311_v30 = vadd.f32 %v374_v26, %v307_v28 }
 0x359   :  { %v298_v31 = vmul.f32 %v387_v18, %v297_v29 }
 0x35a   :  { %vm313_vm11 = vcmp.ge.f32.partialorder %v311_v30, 0.0  ;;  %v315_v33 = vmul.f32 0.01, %v311_v30 }
 0x35b   :  { %v302_v34 = vsel %vm301_vm10, %v387_v18, %v298_v31 }
 0x35c   :  { %v317_v35 = vsel %vm313_vm11, %v311_v30, %v315_v33  ;;  %v304_v36 = vmul.f32 %v302_v34, %v280_v32 }
 0x35d   :  { %364 = vmatmul.msk.f32.vlgmr.msra.gmra.mxu3 %vm256_vm4, %v317_v35 }
 0x35e   :  { %v308_v37 = vmul.f32 %v373_v22, %v304_v36 }
 0x360   :  { %v312_v38 = vadd.f32 %v374_v26, %v308_v37 }
 0x362   :  { %vm314_vm12 = vcmp.ge.f32.partialorder %v312_v38, 0.0  ;;  %v316_v39 = vmul.f32 0.01, %v312_v38 }
 0x364   :  { %v318_v40 = vsel %vm314_vm12, %v312_v38, %v316_v39 }
 0x365   :  { %365 = vmatmul.msk.f32.gmra.mxu3 %vm256_vm4, %v318_v40 }
 0x3e0   :  { %v345_v42 = vpop.f32.mrf.mxu3 }
 0x3e1   :  { %v346_v43 = vadd.f32 %v375_v41, %v345_v42 }
 0x3e3   :  { %351 = vst.msk [vmem:[%s521_s6] sm:$0xff] %vm256_vm4, %v346_v43 }
 0x3e8   :  { %v348_v44 = vpop.f32.mrf.mxu3 }
 0x3e9   :  { %v349_v45 = vadd.f32 %v375_v41, %v348_v44 }
 0x3eb   :  { %352 = vst.msk [vmem:[%s521_s6 + $0x8] sm:$0xff] %vm256_vm4, %v349_v45 }

</bundles_post_ra>
